<compile_context>
chip_gen: v7x
topology: tpu7x:2x2x1
jax: 0.10.0
libtpu: 0.0.40
codegen_flags: <defaults>
</compile_context>

<pallas_src>
import jax
import jax.numpy as jnp
from jax.experimental import pallas as pl
from jax.experimental.pallas import tpu as pltpu


def _device_kind() -> str:
    try:
        return jax.devices()[0].device_kind.lower()
    except Exception:
        return ""


def _make_kernel(mxu_dtype):
    def scale_conv1x1_kernel(w_ref, s_ref, x_ref, o_ref):
        # w_ref: (Cout, Cin)   -- 1x1 conv weight (resident across the hw grid axis)
        # s_ref: (1, Cin)      -- per-channel scale for this batch element
        # x_ref: (Cin, hw_blk) -- activations, channels on sublanes, spatial on lanes
        # o_ref: (Cout, hw_blk)
        # Fold the scale into the weight: (x * s) @ W^T == (W * s) @ x  (smaller operand).
        w_scaled = w_ref[...] * s_ref[...]                   # VPU, broadcast over Cout rows
        x = x_ref[...]
        if mxu_dtype is not None:
            # v5e path: bf16 MXU feed, f32 accumulation.
            w_scaled = w_scaled.astype(mxu_dtype)
            x = x.astype(mxu_dtype)
        o_ref[...] = jnp.dot(
            w_scaled, x, preferred_element_type=jnp.float32
        ).astype(o_ref.dtype)                                # MXU matmul

    return scale_conv1x1_kernel


def fused_scale_conv1x1(scale_nc11, x_nchw, weight_oihw, *, num_hw_blocks=None,
                        mxu_dtype="auto"):
    """Computes Conv2d_1x1(scale * x) with PyTorch NCHW semantics (bias=False)."""
    N, Cin, H, W = x_nchw.shape
    Cout = weight_oihw.shape[0]
    HW = H * W

    kind = _device_kind()
    if num_hw_blocks is None:
        # Chips with 2 TensorCores per device (v7x, and megacore v4/v5p): split the
        # spatial dim so both cores get a 'parallel' block. Single-TC (v5e/v6e): one block.
        two_tc = any(t in kind for t in ("v7", "7x", "v4", "v5p"))
        num_hw_blocks = pl.cdiv(HW, 128) if (two_tc and HW > 128) else 1
    if mxu_dtype == "auto":
        is_v5e = any(t in kind for t in ("v5e", "v5 lite", "v5litepod"))
        mxu_dtype = jnp.bfloat16 if is_v5e else None

    block_hw = HW if num_hw_blocks == 1 else 128

    # Zero-copy views only: no transposes, no .T, no NHWC round-trip.
    x_mat = x_nchw.reshape(N, Cin, HW)          # (N, Cin, HW)
    s_mat = scale_nc11.reshape(N, 1, Cin)       # (N, 1, Cin)
    w_mat = weight_oihw.reshape(Cout, Cin)      # (Cout, Cin)

    cost = pl.CostEstimate(
        flops=2 * N * Cout * Cin * HW,
        transcendentals=0,
        bytes_accessed=4 * (N * Cin * HW + Cout * Cin + N * Cin + N * Cout * HW),
    )

    out = pl.pallas_call(
        _make_kernel(mxu_dtype),
        out_shape=jax.ShapeDtypeStruct((N, Cout, HW), x_mat.dtype),
        grid=(N, num_hw_blocks),
        in_specs=[
            # Weight and per-sample scale are constant along the hw axis -> stay resident.
            pl.BlockSpec((Cout, Cin), lambda n, h: (0, 0)),
            pl.BlockSpec((None, 1, Cin), lambda n, h: (n, 0, 0)),
            pl.BlockSpec((None, Cin, block_hw), lambda n, h: (n, 0, h)),
        ],
        out_specs=pl.BlockSpec((None, Cout, block_hw), lambda n, h: (n, 0, h)),
        compiler_params=pltpu.CompilerParams(
            dimension_semantics=("parallel", "parallel"),
        ),
        cost_estimate=cost,
    )(w_mat, s_mat, x_mat)

    # Free view back to NCHW.
    return out.reshape(N, Cout, H, W)


if __name__ == "__main__":
    key = jax.random.PRNGKey(0)
    k1, k2, k3 = jax.random.split(key, 3)

    N, Cin, H, W, Cout = 1, 720, 14, 14, 120

    # Inputs matching the module's forward signature (x222, x217).
    x217 = jax.random.normal(k1, (N, Cin, H, W), dtype=jnp.float32)
    x222 = jax.random.normal(k2, (N, Cin, 1, 1), dtype=jnp.float32)

    # Deterministic parameter init for Conv2d(720, 120, 1x1, bias=False): (Cout, Cin, 1, 1).
    conv_weight = (
        jax.random.normal(k3, (Cout, Cin, 1, 1), dtype=jnp.float32) * 0.02
    )

    out = fused_scale_conv1x1(x222, x217, conv_weight)
    out = jax.block_until_ready(out)
    assert out.shape == (N, Cout, H, W), out.shape

    # Pure-JAX reference of the fused semantics (mul then 1x1 conv) at highest matmul
    # precision, so the f32-accumulating Pallas dot is compared against a stable baseline.
    ref = jnp.einsum(
        "nchw,oc->nohw",
        x217 * x222,
        conv_weight.reshape(Cout, Cin),
        precision=jax.lax.Precision.HIGHEST,
    )
    # bf16 MXU feed (auto-enabled on v5e only) needs a looser tolerance.
    is_v5e = any(t in _device_kind() for t in ("v5e", "v5 lite", "v5litepod"))
    atol, rtol = (5e-2, 2e-2) if is_v5e else (2e-4, 2e-4)
    assert jnp.allclose(out, ref, atol=atol, rtol=rtol), "mismatch vs reference"

    print("KERNEL_OK")
</pallas_src>

<mosaic_0001>
module attributes {stable_mosaic.version = 11 : i64} {
  func.func @scale_conv1x1_kernel(%arg0: i32, %arg1: i32, %arg2: memref<120x720xf32, #tpu.memory_space<vmem>>, %arg3: memref<1x1x720xf32, #tpu.memory_space<vmem>>, %arg4: memref<1x720x196xf32, #tpu.memory_space<vmem>>, %arg5: memref<1x120x196xf32, #tpu.memory_space<vmem>>) attributes {dimension_semantics = [#tpu.dimension_semantics<parallel>, #tpu.dimension_semantics<parallel>], iteration_bounds = array<i64: 1, 1>, scalar_prefetch = 0 : i64, scratch_operands = 0 : i64, tpu.core_type = #tpu.core_type<tc>, window_params = [{pipeline_mode = #tpu.pipeline_mode<synchronous>, transform_indices = @transform_0, window_bounds = array<i64: 120, 720>}, {transform_indices = @transform_1, window_bounds = array<i64: 1, 1, 720>}, {transform_indices = @transform_2, window_bounds = array<i64: 1, 720, 196>}, {transform_indices = @transform_3, window_bounds = array<i64: 1, 120, 196>}]} {
    %c0 = arith.constant 0 : index
    %c0_0 = arith.constant 0 : index
    %0 = vector.load %arg2[%c0, %c0_0] : memref<120x720xf32, #tpu.memory_space<vmem>>, vector<120x720xf32>
    %c0_1 = arith.constant 0 : index
    %c0_2 = arith.constant 0 : index
    %c0_3 = arith.constant 0 : index
    %1 = vector.load %arg3[%c0_1, %c0_2, %c0_3] : memref<1x1x720xf32, #tpu.memory_space<vmem>>, vector<1x1x720xf32>
    %2 = vector.shape_cast %1 : vector<1x1x720xf32> to vector<1x720xf32>
    %3 = vector.broadcast %2 : vector<1x720xf32> to vector<120x720xf32>
    %4 = arith.mulf %0, %3 : vector<120x720xf32>
    %c0_4 = arith.constant 0 : index
    %c0_5 = arith.constant 0 : index
    %c0_6 = arith.constant 0 : index
    %5 = vector.load %arg4[%c0_4, %c0_5, %c0_6] : memref<1x720x196xf32, #tpu.memory_space<vmem>>, vector<1x720x196xf32>
    %6 = vector.shape_cast %5 : vector<1x720x196xf32> to vector<720x196xf32>
    %cst = arith.constant dense<0.000000e+00> : vector<120x196xf32>
    %7 = tpu.matmul %4, %6, %cst {dimension_numbers = #tpu.dot_dimension_numbers<[1], [0], [0], [1], [0, 0, 1, 1], [], []>} : vector<120x720xf32>, vector<720x196xf32>, vector<120x196xf32> -> vector<120x196xf32>
    %c0_7 = arith.constant 0 : index
    %c0_8 = arith.constant 0 : index
    %c0_9 = arith.constant 0 : index
    %8 = vector.load %arg5[%c0_7, %c0_8, %c0_9] : memref<1x120x196xf32, #tpu.memory_space<vmem>>, vector<1x120x196xf32>
    %9 = vector.shape_cast %8 : vector<1x120x196xf32> to vector<120x196xf32>
    %10 = vector.shape_cast %7 : vector<120x196xf32> to vector<1x120x196xf32>
    tpu.vector_store %arg5[%c0_7, %c0_8, %c0_9], %10 {strides = array<i32>} : memref<1x120x196xf32, #tpu.memory_space<vmem>>, vector<1x120x196xf32>,
    return
  }
  func.func @transform_0(%arg0: i32, %arg1: i32) -> (i32, i32) {
    %c0_i32 = arith.constant 0 : i32
    %c0_i32_0 = arith.constant 0 : i32
    %c0_i32_1 = arith.constant 0 : i32
    return %c0_i32, %c0_i32_0 : i32, i32
  }
  func.func @transform_1(%arg0: i32, %arg1: i32) -> (i32, i32, i32) {
    %c0_i32 = arith.constant 0 : i32
    %c0_i32_0 = arith.constant 0 : i32
    %c0_i32_1 = arith.constant 0 : i32
    return %arg0, %c0_i32, %c0_i32_0 : i32, i32, i32
  }
  func.func @transform_2(%arg0: i32, %arg1: i32) -> (i32, i32, i32) {
    %c0_i32 = arith.constant 0 : i32
    %c0_i32_0 = arith.constant 0 : i32
    return %arg0, %c0_i32, %arg1 : i32, i32, i32
  }
  func.func @transform_3(%arg0: i32, %arg1: i32) -> (i32, i32, i32) {
    %c0_i32 = arith.constant 0 : i32
    %c0_i32_0 = arith.constant 0 : i32
    return %arg0, %c0_i32, %arg1 : i32, i32, i32
  }
}

</mosaic_0001>

<bundles_post_ra>
// kernel: tpu_custom_call.1
= control target key start
LH: loop header
LB: loop body
LE: loop exit
PB: predicated region body
PF: predicated region fallthrough
CT: control target
= control target key end

     0   :  { %vm406_vm0 = vcmask 654336   ;;  %vm918_vm1 = vcmask 556032   ;;  %s2551_s2 = inlined_call_operand.vmem [shape: f32[1,720,196], index: 2, kind: input, shape index: {}]   ;;  %s2552_s0 = inlined_call_operand.vmem [shape: f32[120,720], index: 0, kind: input, shape index: {}]   ;;  %s2553_s1 = inlined_call_operand.vmem [shape: f32[1,1,720], index: 1, kind: input, shape index: {}]   ;;  %s2554_s3 = inlined_call_operand.vmem [shape: f32[1,120,196], index: 3, kind: output, shape index: {}]  }
   0x1   :  { %v227_v0 = vld [vmem:[%s2551_s2 + $0x8] sm:$0xff]  ;;  %v229_v1 = vld [vmem:[%s2551_s2 + $0x18] sm:$0xff]  ;;  %v226_v5 = vld [vmem:[%s2551_s2] sm:$0xff] }
   0x2   :  { %v291_v2 = vld [vmem:[%s2551_s2 + $0x208] sm:$0xff]  ;;  %v967_v3 = vpack.c.bf16 %v229_v1, %v227_v0  ;;  %v293_v4 = vld [vmem:[%s2551_s2 + $0x218] sm:$0xff]  ;;  %v228_v6 = vld [vmem:[%s2551_s2 + $0x10] sm:$0xff] }
   0x3   :  { %v1031_v7 = vpack.c.bf16 %v293_v4, %v291_v2  ;;  %v969_v8 = vpack.c.bf16 %v228_v6, %v226_v5  ;;  %v290_v9 = vld [vmem:[%s2551_s2 + $0x200] sm:$0xff]  ;;  %v292_v10 = vld [vmem:[%s2551_s2 + $0x210] sm:$0xff]  ;;  %v231_v11 = vld [vmem:[%s2551_s2 + $0x28] sm:$0xff] }
   0x4   :  { %968 = vmatprep.subr.bf16.mxu1 %v967_v3  ;;  %v1033_v12 = vpack.c.bf16 %v292_v10, %v290_v9  ;;  %v233_v13 = vld [vmem:[%s2551_s2 + $0x38] sm:$0xff]  ;;  %v295_v14 = vld [vmem:[%s2551_s2 + $0x228] sm:$0xff]  ;;  %v230_v18 = vld [vmem:[%s2551_s2 + $0x20] sm:$0xff] }
   0x5   :  { %v297_v15 = vld [vmem:[%s2551_s2 + $0x238] sm:$0xff]  ;;  %1032 = vmatprep.subr.bf16.mxu0 %v1031_v7  ;;  %970 = vmatpush1.bf16.msra.mxu1 %v969_v8  ;;  %v971_v16 = vpack.c.bf16 %v233_v13, %v231_v11  ;;  %v232_v19 = vld [vmem:[%s2551_s2 + $0x30] sm:$0xff]  ;;  %v294_v20 = vld [vmem:[%s2551_s2 + $0x220] sm:$0xff] }
   0x6   :  { %v1035_v17 = vpack.c.bf16 %v297_v15, %v295_v14  ;;  %1034 = vmatpush1.bf16.msra.mxu0 %v1033_v12  ;;  %v973_v21 = vpack.c.bf16 %v232_v19, %v230_v18  ;;  %v296_v22 = vld [vmem:[%s2551_s2 + $0x230] sm:$0xff]  ;;  %v235_v23 = vld [vmem:[%s2551_s2 + $0x48] sm:$0xff]  ;;  %v237_v24 = vld [vmem:[%s2551_s2 + $0x58] sm:$0xff] }
   0x7   :  { %972 = vmatprep.subr.bf16.mxu1 %v971_v16  ;;  %v1037_v25 = vpack.c.bf16 %v296_v22, %v294_v20  ;;  %v975_v26 = vpack.c.bf16 %v237_v24, %v235_v23  ;;  %v299_v27 = vld [vmem:[%s2551_s2 + $0x248] sm:$0xff]  ;;  %v301_v28 = vld [vmem:[%s2551_s2 + $0x258] sm:$0xff]  ;;  %v234_v29 = vld [vmem:[%s2551_s2 + $0x40] sm:$0xff] }
   0x8   :  { %1036 = vmatprep.subr.bf16.mxu0 %v1035_v17  ;;  %v1039_v30 = vpack.c.bf16 %v301_v28, %v299_v27  ;;  %v236_v31 = vld [vmem:[%s2551_s2 + $0x50] sm:$0xff]  ;;  %v298_v32 = vld [vmem:[%s2551_s2 + $0x240] sm:$0xff]  ;;  %v239_v35 = vld [vmem:[%s2551_s2 + $0x68] sm:$0xff] }
   0x9   :  { %v300_v33 = vld [vmem:[%s2551_s2 + $0x250] sm:$0xff]  ;;  %974 = vmatpush1.bf16.msra.mxu1 %v973_v21  ;;  %v977_v34 = vpack.c.bf16 %v236_v31, %v234_v29  ;;  %v241_v36 = vld [vmem:[%s2551_s2 + $0x78] sm:$0xff]  ;;  %v303_v37 = vld [vmem:[%s2551_s2 + $0x268] sm:$0xff] }
   0xa   :  { %1038 = vmatpush1.bf16.msra.mxu0 %v1037_v25  ;;  %976 = vmatprep.subr.bf16.mxu1 %v975_v26  ;;  %v1041_v38 = vpack.c.bf16 %v300_v33, %v298_v32  ;;  %v979_v39 = vpack.c.bf16 %v241_v36, %v239_v35  ;;  %v305_v40 = vld [vmem:[%s2551_s2 + $0x278] sm:$0xff]  ;;  %v238_v41 = vld [vmem:[%s2551_s2 + $0x60] sm:$0xff]  ;;  %v240_v42 = vld [vmem:[%s2551_s2 + $0x70] sm:$0xff] }
   0xb   :  { %1040 = vmatprep.subr.bf16.mxu0 %v1039_v30  ;;  %v1043_v43 = vpack.c.bf16 %v305_v40, %v303_v37  ;;  %v302_v44 = vld [vmem:[%s2551_s2 + $0x260] sm:$0xff]  ;;  %v304_v45 = vld [vmem:[%s2551_s2 + $0x270] sm:$0xff]  ;;  %v243_v46 = vld [vmem:[%s2551_s2 + $0x88] sm:$0xff]  ;;  %v981_v50 = vpack.c.bf16 %v240_v42, %v238_v41 }
   0xc   :  { %v245_v47 = vld [vmem:[%s2551_s2 + $0x98] sm:$0xff]  ;;  %v307_v48 = vld [vmem:[%s2551_s2 + $0x288] sm:$0xff]  ;;  %v1045_v51 = vpack.c.bf16 %v304_v45, %v302_v44  ;;  %v242_v53 = vld [vmem:[%s2551_s2 + $0x80] sm:$0xff] }
   0xd   :  { %v309_v49 = vld [vmem:[%s2551_s2 + $0x298] sm:$0xff]  ;;  %978 = vmatpush1.bf16.msra.mxu1 %v977_v34  ;;  %v983_v52 = vpack.c.bf16 %v245_v47, %v243_v46  ;;  %v244_v54 = vld [vmem:[%s2551_s2 + $0x90] sm:$0xff]  ;;  %v306_v55 = vld [vmem:[%s2551_s2 + $0x280] sm:$0xff]  ;;  %v106_v47 = vlaneseq }
   0xe   :  { %1042 = vmatpush1.bf16.msra.mxu0 %v1041_v38  ;;  %980 = vmatprep.subr.bf16.mxu1 %v979_v39  ;;  %v1047_v56 = vpack.c.bf16 %v309_v49, %v307_v48  ;;  %v308_v57 = vld [vmem:[%s2551_s2 + $0x290] sm:$0xff]  ;;  %v247_v58 = vld [vmem:[%s2551_s2 + $0xa8] sm:$0xff]  ;;  %v249_v59 = vld [vmem:[%s2551_s2 + $0xb8] sm:$0xff]  ;;  %v985_v62 = vpack.c.bf16 %v244_v54, %v242_v53 }
   0xf   :  { %1044 = vmatprep.subr.bf16.mxu0 %v1043_v43  ;;  %v311_v60 = vld [vmem:[%s2551_s2 + $0x2a8] sm:$0xff]  ;;  %v313_v61 = vld [vmem:[%s2551_s2 + $0x2b8] sm:$0xff]  ;;  %v1049_v63 = vpack.c.bf16 %v308_v57, %v306_v55  ;;  %v987_v0 = vpack.c.bf16 %v249_v59, %v247_v58  ;;  %v246_v1 = vld [vmem:[%s2551_s2 + $0xa0] sm:$0xff] }
  0x10   :  { %v248_v2 = vld [vmem:[%s2551_s2 + $0xb0] sm:$0xff]  ;;  %v310_v3 = vld [vmem:[%s2551_s2 + $0x2a0] sm:$0xff]  ;;  %v1051_v4 = vpack.c.bf16 %v313_v61, %v311_v60  ;;  %v251_v6 = vld [vmem:[%s2551_s2 + $0xc8] sm:$0xff]  ;;  %v1505_v60 = vshrl.u32 %v106_v47, 7 }
  0x11   :  { %982 = vmatpush1.bf16.msra.mxu1 %v981_v50  ;;  %v312_v5 = vld [vmem:[%s2551_s2 + $0x2b0] sm:$0xff]  ;;  %v253_v7 = vld [vmem:[%s2551_s2 + $0xd8] sm:$0xff]  ;;  %v315_v8 = vld [vmem:[%s2551_s2 + $0x2c8] sm:$0xff]  ;;  %v989_v10 = vpack.c.bf16 %v248_v2, %v246_v1 }
  0x12   :  { %1046 = vmatpush1.bf16.msra.mxu0 %v1045_v51  ;;  %984 = vmatprep.subr.bf16.mxu1 %v983_v52  ;;  %v317_v9 = vld [vmem:[%s2551_s2 + $0x2d8] sm:$0xff]  ;;  %v1053_v11 = vpack.c.bf16 %v312_v5, %v310_v3  ;;  %v991_v12 = vpack.c.bf16 %v253_v7, %v251_v6  ;;  %v250_v13 = vld [vmem:[%s2551_s2 + $0xc0] sm:$0xff]  ;;  %v252_v14 = vld [vmem:[%s2551_s2 + $0xd0] sm:$0xff] }
  0x13   :  { %1048 = vmatprep.subr.bf16.mxu0 %v1047_v56  ;;  %v314_v15 = vld [vmem:[%s2551_s2 + $0x2c0] sm:$0xff]  ;;  %v1055_v16 = vpack.c.bf16 %v317_v9, %v315_v8  ;;  %v316_v17 = vld [vmem:[%s2551_s2 + $0x2d0] sm:$0xff]  ;;  %v255_v18 = vld [vmem:[%s2551_s2 + $0xe8] sm:$0xff]  ;;  %v993_v22 = vpack.c.bf16 %v252_v14, %v250_v13 }
  0x14   :  { %v257_v19 = vld [vmem:[%s2551_s2 + $0xf8] sm:$0xff]  ;;  %v319_v20 = vld [vmem:[%s2551_s2 + $0x2e8] sm:$0xff]  ;;  %v1057_v23 = vpack.c.bf16 %v316_v17, %v314_v15  ;;  %v254_v25 = vld [vmem:[%s2551_s2 + $0xe0] sm:$0xff] }
  0x15   :  { %986 = vmatpush1.bf16.msra.mxu1 %v985_v62  ;;  %v321_v21 = vld [vmem:[%s2551_s2 + $0x2f8] sm:$0xff]  ;;  %v995_v24 = vpack.c.bf16 %v257_v19, %v255_v18  ;;  %v256_v26 = vld [vmem:[%s2551_s2 + $0xf0] sm:$0xff]  ;;  %v318_v27 = vld [vmem:[%s2551_s2 + $0x2e0] sm:$0xff]  ;;  %v128_v18 = vsub.s32 5, %v1505_v60  ;;  %v124_v19 = vsub.s32 4, %v1505_v60 }
  0x16   :  { %1050 = vmatpush1.bf16.msra.mxu0 %v1049_v63  ;;  %988 = vmatprep.subr.bf16.mxu1 %v987_v0  ;;  %v1059_v28 = vpack.c.bf16 %v321_v21, %v319_v20  ;;  %v320_v29 = vld [vmem:[%s2551_s2 + $0x2f0] sm:$0xff]  ;;  %v259_v30 = vld [vmem:[%s2551_s2 + $0x108] sm:$0xff]  ;;  %v261_v31 = vld [vmem:[%s2551_s2 + $0x118] sm:$0xff]  ;;  %v997_v34 = vpack.c.bf16 %v256_v26, %v254_v25 }
  0x17   :  { %1052 = vmatprep.subr.bf16.mxu0 %v1051_v4  ;;  %v323_v32 = vld [vmem:[%s2551_s2 + $0x308] sm:$0xff]  ;;  %v325_v33 = vld [vmem:[%s2551_s2 + $0x318] sm:$0xff]  ;;  %v1061_v35 = vpack.c.bf16 %v320_v29, %v318_v27  ;;  %v999_v36 = vpack.c.bf16 %v261_v31, %v259_v30  ;;  %v258_v37 = vld [vmem:[%s2551_s2 + $0x100] sm:$0xff] }
  0x18   :  { %v260_v38 = vld [vmem:[%s2551_s2 + $0x110] sm:$0xff]  ;;  %v322_v39 = vld [vmem:[%s2551_s2 + $0x300] sm:$0xff]  ;;  %v1063_v40 = vpack.c.bf16 %v325_v33, %v323_v32  ;;  %v263_v42 = vld [vmem:[%s2551_s2 + $0x128] sm:$0xff] }
  0x19   :  { %990 = vmatpush1.bf16.msra.mxu1 %v989_v10  ;;  %v324_v41 = vld [vmem:[%s2551_s2 + $0x310] sm:$0xff]  ;;  %v265_v43 = vld [vmem:[%s2551_s2 + $0x138] sm:$0xff]  ;;  %v327_v44 = vld [vmem:[%s2551_s2 + $0x328] sm:$0xff]  ;;  %v1001_v46 = vpack.c.bf16 %v260_v38, %v258_v37 }
  0x1a   :  { %1054 = vmatpush1.bf16.msra.mxu0 %v1053_v11  ;;  %992 = vmatprep.subr.bf16.mxu1 %v991_v12  ;;  %v329_v45 = vld [vmem:[%s2551_s2 + $0x338] sm:$0xff]  ;;  %v1065_v48 = vpack.c.bf16 %v324_v41, %v322_v39  ;;  %v1003_v49 = vpack.c.bf16 %v265_v43, %v263_v42  ;;  %v262_v50 = vld [vmem:[%s2551_s2 + $0x120] sm:$0xff]  ;;  %v264_v51 = vld [vmem:[%s2551_s2 + $0x130] sm:$0xff]  ;;  %v112_v11 = vsub.s32 1, %v1505_v60  ;;  %v120_v12 = vsub.s32 3, %v1505_v60 }
  0x1b   :  { %1056 = vmatprep.subr.bf16.mxu0 %v1055_v16  ;;  %v326_v52 = vld [vmem:[%s2551_s2 + $0x320] sm:$0xff]  ;;  %v1067_v53 = vpack.c.bf16 %v329_v45, %v327_v44  ;;  %v328_v54 = vld [vmem:[%s2551_s2 + $0x330] sm:$0xff]  ;;  %v267_v55 = vld [vmem:[%s2551_s2 + $0x148] sm:$0xff]  ;;  %v1005_v59 = vpack.c.bf16 %v264_v51, %v262_v50 }
  0x1c   :  { %v269_v56 = vld [vmem:[%s2551_s2 + $0x158] sm:$0xff]  ;;  %v331_v57 = vld [vmem:[%s2551_s2 + $0x348] sm:$0xff]  ;;  %v1069_v61 = vpack.c.bf16 %v328_v54, %v326_v52  ;;  %v266_v63 = vld [vmem:[%s2551_s2 + $0x140] sm:$0xff] }
  0x1d   :  { %994 = vmatpush1.bf16.msra.mxu1 %v993_v22  ;;  %v333_v58 = vld [vmem:[%s2551_s2 + $0x358] sm:$0xff]  ;;  %v1007_v62 = vpack.c.bf16 %v269_v56, %v267_v55  ;;  %v268_v0 = vld [vmem:[%s2551_s2 + $0x150] sm:$0xff]  ;;  %v330_v1 = vld [vmem:[%s2551_s2 + $0x340] sm:$0xff] }
  0x1e   :  { %1058 = vmatpush1.bf16.msra.mxu0 %v1057_v23  ;;  %996 = vmatprep.subr.bf16.mxu1 %v995_v24  ;;  %v1071_v2 = vpack.c.bf16 %v333_v58, %v331_v57  ;;  %v332_v3 = vld [vmem:[%s2551_s2 + $0x350] sm:$0xff]  ;;  %v271_v4 = vld [vmem:[%s2551_s2 + $0x168] sm:$0xff]  ;;  %v273_v5 = vld [vmem:[%s2551_s2 + $0x178] sm:$0xff]  ;;  %v1009_v8 = vpack.c.bf16 %v268_v0, %v266_v63 }
  0x1f   :  { %1060 = vmatprep.subr.bf16.mxu0 %v1059_v28  ;;  %v335_v6 = vld [vmem:[%s2551_s2 + $0x368] sm:$0xff]  ;;  %v337_v7 = vld [vmem:[%s2551_s2 + $0x378] sm:$0xff]  ;;  %v270_v9 = vld [vmem:[%s2551_s2 + $0x160] sm:$0xff]  ;;  %v1073_v13 = vpack.c.bf16 %v332_v3, %v330_v1  ;;  %v1011_v14 = vpack.c.bf16 %v273_v5, %v271_v4 }
  0x20   :  { %v272_v10 = vld [vmem:[%s2551_s2 + $0x170] sm:$0xff]  ;;  %v334_v15 = vld [vmem:[%s2551_s2 + $0x360] sm:$0xff]  ;;  %v275_v17 = vld [vmem:[%s2551_s2 + $0x188] sm:$0xff]  ;;  %v1075_v20 = vpack.c.bf16 %v337_v7, %v335_v6  ;;  %v108_v6 = vsub.s32 0, %v1505_v60 }
  0x21   :  { %998 = vmatpush1.bf16.msra.mxu1 %v997_v34  ;;  %v336_v16 = vld [vmem:[%s2551_s2 + $0x370] sm:$0xff]  ;;  %v277_v21 = vld [vmem:[%s2551_s2 + $0x198] sm:$0xff]  ;;  %v339_v22 = vld [vmem:[%s2551_s2 + $0x388] sm:$0xff]  ;;  %v1013_v27 = vpack.c.bf16 %v272_v10, %v270_v9 }
  0x22   :  { %1062 = vmatpush1.bf16.msra.mxu0 %v1061_v35  ;;  %1000 = vmatprep.subr.bf16.mxu1 %v999_v36  ;;  %v341_v23 = vld [vmem:[%s2551_s2 + $0x398] sm:$0xff]  ;;  %v15_v24 = vld [vmem:[%s2552_s0 + $0x8] sm:$0xff]  ;;  %v1565_v25 = vld [vmem:[%s2553_s1] sm:$0x3f]  ;;  %v1077_v28 = vpack.c.bf16 %v336_v16, %v334_v15  ;;  %v1015_v31 = vpack.c.bf16 %v277_v21, %v275_v17 }
  0x23   :  { %1064 = vmatprep.subr.bf16.mxu0 %v1063_v40  ;;  %v17_v26 = vld [vmem:[%s2552_s0 + $0x18] sm:$0xff]  ;;  %v1571_v29 = vrot.slane %v1565_v25, %v112_v11  ;;  %v1574_v30 = vrot.slane %v1565_v25, %v120_v12  ;;  %v274_v32 = vld [vmem:[%s2551_s2 + $0x180] sm:$0xff]  ;;  %v276_v33 = vld [vmem:[%s2551_s2 + $0x190] sm:$0xff]  ;;  %v1586_v35 = vrot.slane %v1565_v25, %v128_v18  ;;  %v1589_v36 = vrot.slane %v1565_v25, %v124_v19 }
  0x24   :  { %v338_v34 = vld [vmem:[%s2551_s2 + $0x380] sm:$0xff]  ;;  %v1079_v37 = vpack.c.bf16 %v341_v23, %v339_v22  ;;  %v340_v38 = vld [vmem:[%s2551_s2 + $0x390] sm:$0xff]  ;;  %v279_v39 = vld [vmem:[%s2551_s2 + $0x1a8] sm:$0xff]  ;;  %v1017_v45 = vpack.c.bf16 %v276_v33, %v274_v32  ;;  %v1677_v17 = vrot.slane %v1565_v25, %v108_v6 }
  0x25   :  { %1002 = vmatpush1.bf16.msra.mxu1 %v1001_v46  ;;  %v281_v40 = vld [vmem:[%s2551_s2 + $0x1b8] sm:$0xff]  ;;  %v137_v41 = vmul.f32 %v1571_v29, %v15_v24  ;;  %v139_v42 = vmul.f32 %v1574_v30, %v17_v26  ;;  %v343_v43 = vld [vmem:[%s2551_s2 + $0x3a8] sm:$0xff]  ;;  %v1081_v46 = vpack.c.bf16 %v340_v38, %v338_v34  ;;  %v342_v50 = vld [vmem:[%s2551_s2 + $0x3a0] sm:$0xff] }
  0x26   :  { %1066 = vmatpush1.bf16.msra.mxu0 %v1065_v48  ;;  %1004 = vmatprep.subr.bf16.mxu1 %v1003_v49  ;;  %v345_v44 = vld [vmem:[%s2551_s2 + $0x3b8] sm:$0xff]  ;;  %v1019_v47 = vpack.c.bf16 %v281_v40, %v279_v39  ;;  %v278_v48 = vld [vmem:[%s2551_s2 + $0x1a0] sm:$0xff]  ;;  %v280_v49 = vld [vmem:[%s2551_s2 + $0x1b0] sm:$0xff] }
  0x27   :  { %1068 = vmatprep.subr.bf16.mxu0 %v1067_v53  ;;  %516 = vmatprep.mubr.f32.mxu1 %v137_v41  ;;  %v1083_v51 = vpack.c.bf16 %v345_v44, %v343_v43  ;;  %v344_v52 = vld [vmem:[%s2551_s2 + $0x3b0] sm:$0xff]  ;;  %v283_v53 = vld [vmem:[%s2551_s2 + $0x1c8] sm:$0xff]  ;;  %v285_v54 = vld [vmem:[%s2551_s2 + $0x1d8] sm:$0xff]  ;;  %v1021_v57 = vpack.c.bf16 %v280_v49, %v278_v48 }
  0x28   :  { %671 = vmatprep.mubr.f32.mxu0 %v139_v42  ;;  %v347_v55 = vld [vmem:[%s2551_s2 + $0x3c8] sm:$0xff]  ;;  %v349_v56 = vld [vmem:[%s2551_s2 + $0x3d8] sm:$0xff]  ;;  %v1085_v58 = vpack.c.bf16 %v344_v52, %v342_v50  ;;  %v346_v63 = vld [vmem:[%s2551_s2 + $0x3c0] sm:$0xff] }
  0x29   :  { %1006 = vmatpush1.bf16.msra.mxu1 %v1005_v59  ;;  %v1023_v59 = vpack.c.bf16 %v285_v54, %v283_v53  ;;  %v1087_v0 = vpack.c.bf16 %v349_v56, %v347_v55  ;;  %v348_v1 = vld [vmem:[%s2551_s2 + $0x3d0] sm:$0xff]  ;;  %v289_v3 = vld [vmem:[%s2551_s2 + $0x1f8] sm:$0xff]  ;;  %v351_v4 = vld [vmem:[%s2551_s2 + $0x3e8] sm:$0xff] }
  0x2a   :  { %1070 = vmatpush1.bf16.msra.mxu0 %v1069_v61  ;;  %1008 = vmatprep.subr.bf16.mxu1 %v1007_v62  ;;  %v282_v61 = vld [vmem:[%s2551_s2 + $0x1c0] sm:$0xff]  ;;  %v284_v62 = vld [vmem:[%s2551_s2 + $0x1d0] sm:$0xff]  ;;  %v353_v5 = vld [vmem:[%s2551_s2 + $0x3f8] sm:$0xff]  ;;  %v1089_v9 = vpack.c.bf16 %v348_v1, %v346_v63 }
  0x2b   :  { %1072 = vmatprep.subr.bf16.mxu0 %v1071_v2  ;;  %v287_v2 = vld [vmem:[%s2551_s2 + $0x1e8] sm:$0xff]  ;;  %v1025_v7 = vpack.c.bf16 %v284_v62, %v282_v61  ;;  %v286_v11 = vld [vmem:[%s2551_s2 + $0x1e0] sm:$0xff]  ;;  %v288_v12 = vld [vmem:[%s2551_s2 + $0x1f0] sm:$0xff] }
  0x2c   :  { %v1027_v10 = vpack.c.bf16 %v289_v3, %v287_v2  ;;  %v355_v15 = vld [vmem:[%s2551_s2 + $0x408] sm:$0xff]  ;;  %v357_v16 = vld [vmem:[%s2551_s2 + $0x418] sm:$0xff]  ;;  %v1029_v18 = vpack.c.bf16 %v288_v12, %v286_v11  ;;  %v14_v19 = vld [vmem:[%s2552_s0] sm:$0xff] }
  0x2d   :  { %1010 = vmatpush1.bf16.msra.mxu1 %v1009_v8  ;;  %v116_v8 = vsub.s32 2, %v1505_v60  ;;  %v352_v60 = vld [vmem:[%s2551_s2 + $0x3f0] sm:$0xff]  ;;  %v354_v22 = vld [vmem:[%s2551_s2 + $0x400] sm:$0xff]  ;;  %v1095_v24 = vpack.c.bf16 %v357_v16, %v355_v15  ;;  %v359_v32 = vld [vmem:[%s2551_s2 + $0x428] sm:$0xff]  ;;  %v136_v34 = vmul.f32 %v1677_v17, %v14_v19 }
  0x2e   :  { %1074 = vmatpush1.bf16.msra.mxu0 %v1073_v13  ;;  %1012 = vmatprep.subr.bf16.mxu1 %v1011_v14  ;;  %v350_v13 = vld [vmem:[%s2551_s2 + $0x3e0] sm:$0xff]  ;;  %v1091_v14 = vpack.c.bf16 %v353_v5, %v351_v4  ;;  %v356_v26 = vld [vmem:[%s2551_s2 + $0x410] sm:$0xff]  ;;  %v361_v33 = vld [vmem:[%s2551_s2 + $0x438] sm:$0xff] }
  0x2f   :  { %1076 = vmatprep.subr.bf16.mxu0 %v1075_v20  ;;  %v16_v20 = vld [vmem:[%s2552_s0 + $0x10] sm:$0xff]  ;;  %v1686_v21 = vrot.slane %v1565_v25, %v116_v8  ;;  %v1093_v23 = vpack.c.bf16 %v352_v60, %v350_v13  ;;  %v23_v25 = vld [vmem:[%s2552_s0 + $0x48] sm:$0xff]  ;;  %v29_v40 = vld [vmem:[%s2552_s0 + $0x78] sm:$0xff]  ;;  %v1099_v53 = vpack.c.bf16 %v361_v33, %v359_v32 }
  0x30   :  { %v360_v38 = vld [vmem:[%s2551_s2 + $0x430] sm:$0xff]  ;;  %v27_v39 = vld [vmem:[%s2552_s0 + $0x68] sm:$0xff]  ;;  %v26_v43 = vld [vmem:[%s2552_s0 + $0x60] sm:$0xff]  ;;  %v145_v48 = vmul.f32 %v1574_v30, %v23_v25  ;;  %v151_v1 = vmul.f32 %v1574_v30, %v29_v40 }
  0x31   :  { %1014 = vmatpush1.bf16.msra.mxu1 %v1013_v27  ;;  %v21_v27 = vld [vmem:[%s2552_s0 + $0x38] sm:$0xff]  ;;  %v138_v41 = vmul.f32 %v1686_v21, %v16_v20  ;;  %v28_v44 = vld [vmem:[%s2552_s0 + $0x70] sm:$0xff]  ;;  %v35_v50 = vld [vmem:[%s2552_s0 + $0xa8] sm:$0xff]  ;;  %v148_v5 = vmul.f32 %v1677_v17, %v26_v43 }
  0x32   :  { %1078 = vmatpush1.bf16.msra.mxu0 %v1077_v28  ;;  %1016 = vmatprep.subr.bf16.mxu1 %v1015_v31  ;;  %v20_v28 = vld [vmem:[%s2552_s0 + $0x30] sm:$0xff]  ;;  %v22_v31 = vld [vmem:[%s2552_s0 + $0x40] sm:$0xff]  ;;  %v143_v42 = vmul.f32 %v1571_v29, %v21_v27  ;;  %v33_v49 = vld [vmem:[%s2552_s0 + $0x98] sm:$0xff]  ;;  %v150_v6 = vmul.f32 %v1686_v21, %v28_v44  ;;  %v157_v12 = vmul.f32 %v1574_v30, %v35_v50 }
  0x33   :  { %1080 = vmatprep.subr.bf16.mxu0 %v1079_v37  ;;  %v358_v37 = vld [vmem:[%s2551_s2 + $0x420] sm:$0xff]  ;;  %v364_v52 = vld [vmem:[%s2551_s2 + $0x450] sm:$0xff]  ;;  %v367_v56 = vld [vmem:[%s2551_s2 + $0x468] sm:$0xff]  ;;  %v155_v11 = vmul.f32 %v1571_v29, %v33_v49 }
  0x34   :  { %v32_v54 = vld [vmem:[%s2552_s0 + $0x90] sm:$0xff]  ;;  %v34_v55 = vld [vmem:[%s2552_s0 + $0xa0] sm:$0xff]  ;;  %v39_v61 = vld [vmem:[%s2552_s0 + $0xc8] sm:$0xff]  ;;  %v1101_v63 = vpack.c.bf16 %v360_v38, %v358_v37 }
  0x35   :  { %1018 = vmatpush1.bf16.msra.mxu1 %v1017_v45  ;;  %v363_v45 = vld [vmem:[%s2551_s2 + $0x448] sm:$0xff]  ;;  %v41_v62 = vld [vmem:[%s2552_s0 + $0xd8] sm:$0xff]  ;;  %v366_v2 = vld [vmem:[%s2551_s2 + $0x460] sm:$0xff]  ;;  %v154_v16 = vmul.f32 %v1677_v17, %v32_v54 }
  0x36   :  { %1082 = vmatpush1.bf16.msra.mxu0 %v1081_v46  ;;  %1020 = vmatprep.subr.bf16.mxu1 %v1019_v47  ;;  %v365_v46 = vld [vmem:[%s2551_s2 + $0x458] sm:$0xff]  ;;  %v1097_v47 = vpack.c.bf16 %v356_v26, %v354_v22  ;;  %v368_v3 = vld [vmem:[%s2551_s2 + $0x470] sm:$0xff]  ;;  %v38_v4 = vld [vmem:[%s2552_s0 + $0xc0] sm:$0xff]  ;;  %v1820_v26 = vmul.f32 %v1574_v30, %v41_v62 }
  0x37   :  { %1084 = vmatprep.subr.bf16.mxu0 %v1083_v51  ;;  %v362_v51 = vld [vmem:[%s2551_s2 + $0x440] sm:$0xff]  ;;  %v40_v8 = vld [vmem:[%s2552_s0 + $0xd0] sm:$0xff]  ;;  %v373_v60 = vld [vmem:[%s2551_s2 + $0x498] sm:$0xff]  ;;  %v1822_v27 = vpack.c.bf16 %v368_v3, %v366_v2  ;;  %v1837_v33 = vmul.f32 %v1677_v17, %v38_v4 }
  0x38   :  { %v1105_v13 = vpack.c.bf16 %v364_v52, %v362_v51  ;;  %v44_v15 = vld [vmem:[%s2552_s0 + $0xf0] sm:$0xff]  ;;  %v46_v20 = vld [vmem:[%s2552_s0 + $0x100] sm:$0xff]  ;;  %v51_v25 = vld [vmem:[%s2552_s0 + $0x128] sm:$0xff] }
  0x39   :  { %1022 = vmatpush1.bf16.msra.mxu1 %v1021_v57  ;;  %v142_v57 = vmul.f32 %v1677_v17, %v20_v28  ;;  %v370_v22 = vld [vmem:[%s2551_s2 + $0x480] sm:$0xff]  ;;  %v53_v28 = vld [vmem:[%s2552_s0 + $0x138] sm:$0xff]  ;;  %v52_v37 = vld [vmem:[%s2552_s0 + $0x130] sm:$0xff]  ;;  %v1876_v49 = vmul.f32 %v1686_v21, %v46_v20 }
  0x3a   :  { %1086 = vmatpush1.bf16.msra.mxu0 %v1085_v58  ;;  %1024 = vmatprep.subr.bf16.mxu1 %v1023_v59  ;;  %v144_v58 = vmul.f32 %v1686_v21, %v22_v31  ;;  %v369_v59 = vld [vmem:[%s2551_s2 + $0x478] sm:$0xff]  ;;  %v87_v31 = vld [vmem:[%s2552_s0 + $0x248] sm:$0xff]  ;;  %v1923_v2 = vmul.f32 %v1686_v21, %v52_v37  ;;  %v66_v20 = vld [vmem:[%s2552_s0 + $0x1a0] sm:$0xff] }
  0x3b   :  { %1088 = vmatprep.subr.bf16.mxu0 %v1087_v0  ;;  %v149_v0 = vmul.f32 %v1571_v29, %v27_v39  ;;  %v1107_v19 = vpack.c.bf16 %v369_v59, %v367_v56  ;;  %v89_v32 = vld [vmem:[%s2552_s0 + $0x258] sm:$0xff]  ;;  %v375_v38 = vld [vmem:[%s2551_s2 + $0x4a8] sm:$0xff]  ;;  %v1849_v39 = vmul.f32 %v1571_v29, %v87_v31  ;;  %v1905_v59 = vmul.f32 %v1571_v29, %v51_v25 }
  0x3c   :  { %v1852_v40 = vmul.f32 %v1574_v30, %v89_v32  ;;  %v377_v44 = vld [vmem:[%s2551_s2 + $0x4b8] sm:$0xff]  ;;  %v95_v52 = vld [vmem:[%s2552_s0 + $0x288] sm:$0xff] }
  0x3d   :  { %1026 = vmatpush1.bf16.msra.mxu1 %v1025_v7  ;;  %v1103_v7 = vpack.c.bf16 %v365_v46, %v363_v45  ;;  %v374_v45 = vld [vmem:[%s2551_s2 + $0x4a0] sm:$0xff]  ;;  %v376_v46 = vld [vmem:[%s2551_s2 + $0x4b0] sm:$0xff]  ;;  %v57_v50 = vld [vmem:[%s2552_s0 + $0x158] sm:$0xff]  ;;  %v1925_v3 = vpack.c.bf16 %v377_v44, %v375_v38 }
  0x3e   :  { %1090 = vmatpush1.bf16.msra.mxu0 %v1089_v9  ;;  %1028 = vmatprep.subr.bf16.mxu1 %v1027_v10  ;;  %v45_v9 = vld [vmem:[%s2552_s0 + $0xf8] sm:$0xff]  ;;  %v47_v10 = vld [vmem:[%s2552_s0 + $0x108] sm:$0xff] }
  0x3f   :  { %1092 = vmatprep.subr.bf16.mxu0 %v1091_v14  ;;  %v371_v14 = vld [vmem:[%s2551_s2 + $0x488] sm:$0xff]  ;;  %v1861_v43 = vmul.f32 %v1574_v30, %v47_v10  ;;  %v93_v51 = vld [vmem:[%s2552_s0 + $0x278] sm:$0xff] }
  0x40   :  { %v59_v54 = vld [vmem:[%s2552_s0 + $0x168] sm:$0xff]  ;;  %v381_v56 = vld [vmem:[%s2551_s2 + $0x4d8] sm:$0xff] }
  0x41   :  { %1030 = vmatpush1.bf16.msra.mxu1 %v1029_v18  ;;  %v1807_v18 = vmul.f32 %v1686_v21, %v34_v55  ;;  %v379_v55 = vld [vmem:[%s2551_s2 + $0x4c8] sm:$0xff]  ;;  %v73_v25 = vld [vmem:[%s2552_s0 + $0x1d8] sm:$0xff] }
  0x42   :  { %1094 = vmatpush1.bf16.msra.mxu0 %v1093_v23  ;;  %1147 = vmatprep.subr.bf16.mxu1 %v1095_v24  ;;  %v372_v23 = vld [vmem:[%s2551_s2 + $0x490] sm:$0xff]  ;;  %v383_v4 = vld [vmem:[%s2551_s2 + $0x4e8] sm:$0xff]  ;;  %v2001_v31 = vmul.f32 %v1586_v35, %v73_v25  ;;  %v65_v25 = vld [vmem:[%s2552_s0 + $0x198] sm:$0xff] }
  0x43   :  { %1096 = vmatprep.subr.bf16.mxu0 %v1095_v24  ;;  %v161_v24 = vmul.f32 %v1571_v29, %v39_v61  ;;  %v1908_v61 = vmul.f32 %v1574_v30, %v53_v28  ;;  %v24_v28 = vld [vmem:[%s2552_s0 + $0x50] sm:$0xff]  ;;  %v31_v37 = vld [vmem:[%s2552_s0 + $0x88] sm:$0xff] }
  0x44   :  { %517 = vmatmul.mubr.f32.vlgmr.msra.gmra.mrb[0].mxu1 %v136_v34  ;;  %v50_v34 = vld [vmem:[%s2552_s0 + $0x120] sm:$0xff]  ;;  %v2004_v32 = vmul.f32 %v1589_v36, %v24_v28  ;;  %v79_v38 = vld [vmem:[%s2552_s0 + $0x208] sm:$0xff]  ;;  %v2021_v44 = vmul.f32 %v1586_v35, %v31_v37 }
  0x45   :  { %672 = vmatmul.mubr.f32.vlgmr.msra.gmra.mrb[0].mxu0 %v138_v41  ;;  %522 = vmatprep.mubr.f32.mxu1 %v143_v42  ;;  %v1855_v41 = vmul.f32 %v1686_v21, %v40_v8  ;;  %v1858_v42 = vmul.f32 %v1571_v29, %v45_v9  ;;  %v1911_v62 = vmul.f32 %v1677_v17, %v50_v34 }
  0x46   :  { %1098 = vmatpush1.bf16.msra.mxu0 %v1097_v47  ;;  %677 = vmatprep.mubr.f32.mxu0 %v145_v48  ;;  %v1873_v48 = vmul.f32 %v1677_v17, %v44_v15  ;;  %v1939_v8 = vpack.c.bf16 %v376_v46, %v374_v45  ;;  %v1942_v9 = vmul.f32 %v1571_v29, %v57_v50  ;;  %v37_v50 = vld [vmem:[%s2552_s0 + $0xb8] sm:$0xff] }
  0x47   :  { %1160 = vmatpush1.bf16.msra.mxu1 %v1097_v47  ;;  %1100 = vmatprep.subr.bf16.mxu0 %v1099_v53  ;;  %v1111_v47 = vpack.c.bf16 %v373_v60, %v371_v14  ;;  %v19_v14 = vld [vmem:[%s2552_s0 + $0x28] sm:$0xff]  ;;  %v2024_v45 = vmul.f32 %v1586_v35, %v79_v38  ;;  %v96_v38 = vld [vmem:[%s2552_s0 + $0x290] sm:$0xff] }
  0x48   :  { %523 = vmatmul.mubr.f32.gmra.mrb[2].mxu1 %v142_v57  ;;  %1148 = vmatprep.subr.bf16.mxu1 %v1099_v53  ;;  %v1887_v53 = vpack.c.bf16 %v372_v23, %v370_v22  ;;  %v1899_v57 = vmul.f32 %v1571_v29, %v93_v51  ;;  %v67_v60 = vld [vmem:[%s2552_s0 + $0x1a8] sm:$0xff]  ;;  %v25_v22 = vld [vmem:[%s2552_s0 + $0x58] sm:$0xff]  ;;  %v2044_v51 = vmul.f32 %v1586_v35, %v37_v50 }
  0x49   :  { %678 = vmatmul.mubr.f32.gmra.mrb[2].mxu0 %v144_v58  ;;  %528 = vmatprep.mubr.f32.mxu1 %v149_v0  ;;  %v1902_v58 = vmul.f32 %v1574_v30, %v95_v52  ;;  %v380_v0 = vld [vmem:[%s2551_s2 + $0x4d0] sm:$0xff] }
  0x4a   :  { %1102 = vmatpush1.bf16.msra.mxu0 %v1101_v63  ;;  %683 = vmatprep.mubr.f32.mxu0 %v151_v1  ;;  %v99_v1 = vld [vmem:[%s2552_s0 + $0x2a8] sm:$0xff] }
  0x4b   :  { %1161 = vmatpush1.bf16.msra.mxu1 %v1101_v63  ;;  %1104 = vmatprep.subr.bf16.mxu0 %v1103_v7  ;;  %v378_v63 = vld [vmem:[%s2551_s2 + $0x4c0] sm:$0xff] }
  0x4c   :  { %529 = vmatmul.mubr.f32.gmra.mrb[4].mxu1 %v148_v5  ;;  %1149 = vmatprep.subr.bf16.mxu1 %v1103_v7  ;;  %v385_v5 = vld [vmem:[%s2551_s2 + $0x4f8] sm:$0xff] }
  0x4d   :  { %684 = vmatmul.mubr.f32.gmra.mrb[4].mxu0 %v150_v6  ;;  %534 = vmatprep.mubr.f32.mxu1 %v155_v11  ;;  %v1934_v6 = vmul.f32 %v1571_v29, %v99_v1  ;;  %v101_v7 = vld [vmem:[%s2552_s0 + $0x2b8] sm:$0xff]  ;;  %v1949_v11 = vmul.f32 %v1574_v30, %v59_v54  ;;  %v1963_v15 = vpack.c.bf16 %v385_v5, %v383_v4  ;;  %v36_v54 = vld [vmem:[%s2552_s0 + $0xb0] sm:$0xff]  ;;  %v91_v4 = vld [vmem:[%s2552_s0 + $0x268] sm:$0xff] }
  0x4e   :  { %689 = vmatprep.mubr.f32.mxu0 %v157_v12  ;;  %1106 = vmatpush1.bf16.msra.mxu0 %v1105_v13  ;;  %v1945_v10 = vmul.f32 %v1574_v30, %v101_v7  ;;  %v1951_v12 = vpack.c.bf16 %v381_v56, %v379_v55  ;;  %v84_v55 = vld [vmem:[%s2552_s0 + $0x230] sm:$0xff]  ;;  %v90_v5 = vld [vmem:[%s2552_s0 + $0x260] sm:$0xff] }
  0x4f   :  { %1108 = vmatprep.subr.bf16.mxu0 %v1107_v19  ;;  %1162 = vmatpush1.bf16.msra.mxu1 %v1105_v13  ;;  %v1953_v13 = vpack.c.bf16 %v380_v0, %v378_v63  ;;  %v56_v56 = vld [vmem:[%s2552_s0 + $0x150] sm:$0xff]  ;;  %v2064_v63 = vmul.f32 %v1589_v36, %v36_v54  ;;  %v2067_v0 = vmul.f32 %v1589_v36, %v84_v55  ;;  %v58_v7 = vld [vmem:[%s2552_s0 + $0x160] sm:$0xff] }
  0x50   :  { %535 = vmatmul.mubr.f32.gmra.mrb[6].mxu1 %v154_v16  ;;  %1150 = vmatprep.subr.bf16.mxu1 %v1107_v19  ;;  %v1966_v16 = vmul.f32 %v1586_v35, %v19_v14  ;;  %v18_v19 = vld [vmem:[%s2552_s0 + $0x20] sm:$0xff]  ;;  %v63_v14 = vld [vmem:[%s2552_s0 + $0x188] sm:$0xff] }
  0x51   :  { %690 = vmatmul.mubr.f32.gmra.mrb[6].mxu0 %v1807_v18  ;;  %540 = vmatprep.mubr.f32.mxu1 %v161_v24  ;;  %v1969_v18 = vmul.f32 %v1586_v35, %v67_v60  ;;  %v1982_v23 = vmul.f32 %v1589_v36, %v18_v19  ;;  %v1985_v24 = vmul.f32 %v1589_v36, %v66_v20  ;;  %v102_v54 = vld [vmem:[%s2552_s0 + $0x2c0] sm:$0xff] }
  0x52   :  { %695 = vmatprep.mubr.f32.mxu0 %v1820_v26  ;;  %1110 = vmatpush1.bf16.msra.mxu0 %v1822_v27  ;;  %v1988_v26 = vmul.f32 %v1586_v35, %v25_v22  ;;  %v2090_v60 = vmul.f32 %v1586_v35, %v91_v4  ;;  %v2096_v20 = vmul.f32 %v1589_v36, %v90_v5  ;;  %v48_v22 = vld [vmem:[%s2552_s0 + $0x110] sm:$0xff]  ;;  %v382_v55 = vld [vmem:[%s2551_s2 + $0x4e0] sm:$0xff] }
  0x53   :  { %1163 = vmatpush1.bf16.msra.mxu1 %v1822_v27  ;;  %1112 = vmatprep.subr.bf16.mxu0 %v1111_v47  ;;  %v72_v27 = vld [vmem:[%s2552_s0 + $0x1d0] sm:$0xff]  ;;  %v2119_v37 = vmul.f32 %v1589_v36, %v48_v22  ;;  %v389_v22 = vld [vmem:[%s2551_s2 + $0x518] sm:$0xff] }
  0x54   :  { %541 = vmatmul.mubr.f32.gmra.mrb[8].mxu1 %v1837_v33  ;;  %1151 = vmatprep.subr.bf16.mxu1 %v1111_v47  ;;  %v2007_v34 = vmul.f32 %v1589_v36, %v72_v27  ;;  %v30_v33 = vld [vmem:[%s2552_s0 + $0x80] sm:$0xff] }
  0x55   :  { %696 = vmatmul.mubr.f32.gmra.mrb[8].mxu0 %v1855_v41  ;;  %546 = vmatprep.mubr.f32.mxu1 %v1858_v42  ;;  %v2027_v46 = vmul.f32 %v1589_v36, %v30_v33  ;;  %v78_v47 = vld [vmem:[%s2552_s0 + $0x200] sm:$0xff]  ;;  %v85_v41 = vld [vmem:[%s2552_s0 + $0x238] sm:$0xff]  ;;  %v2133_v33 = vmul.f32 %v1589_v36, %v96_v38  ;;  %v187_v38 = vmul.f32 %v1574_v30, %v65_v25  ;;  %v388_v25 = vld [vmem:[%s2551_s2 + $0x510] sm:$0xff] }
  0x56   :  { %701 = vmatprep.mubr.f32.mxu0 %v1861_v43  ;;  %1114 = vmatpush1.bf16.msra.mxu0 %v1887_v53  ;;  %v2041_v42 = vmul.f32 %v1589_v36, %v78_v47  ;;  %v2047_v52 = vmul.f32 %v1586_v35, %v85_v41  ;;  %v43_v43 = vld [vmem:[%s2552_s0 + $0xe8] sm:$0xff]  ;;  %v54_v41 = vld [vmem:[%s2552_s0 + $0x140] sm:$0xff] }
  0x57   :  { %1164 = vmatpush1.bf16.msra.mxu1 %v1887_v53  ;;  %1116 = vmatprep.subr.bf16.mxu0 %v1925_v3  ;;  %v2070_v1 = vmul.f32 %v1586_v35, %v43_v43  ;;  %v42_v53 = vld [vmem:[%s2552_s0 + $0xe0] sm:$0xff]  ;;  %v384_v43 = vld [vmem:[%s2551_s2 + $0x4f0] sm:$0xff]  ;;  %v2159_v4 = vmul.f32 %v1589_v36, %v54_v41 }
  0x58   :  { %547 = vmatmul.mubr.f32.gmra.mrb[10].mxu1 %v1873_v48  ;;  %1152 = vmatprep.subr.bf16.mxu1 %v1925_v3  ;;  %v2093_v19 = vmul.f32 %v1589_v36, %v42_v53  ;;  %v49_v48 = vld [vmem:[%s2552_s0 + $0x118] sm:$0xff]  ;;  %v2162_v53 = vmul.f32 %v1589_v36, %v102_v54 }
  0x59   :  { %v97_v3 = vld [vmem:[%s2552_s0 + $0x298] sm:$0xff]  ;;  %702 = vmatmul.mubr.f32.gmra.mrb[10].mxu0 %v1876_v49  ;;  %552 = vmatprep.mubr.f32.mxu1 %v1905_v59  ;;  %v2113_v28 = vmul.f32 %v1586_v35, %v49_v48  ;;  %v55_v49 = vld [vmem:[%s2552_s0 + $0x148] sm:$0xff]  ;;  %v178_v48 = vmul.f32 %v1677_v17, %v56_v56  ;;  %v185_v56 = vmul.f32 %v1571_v29, %v63_v14  ;;  %v386_v14 = vld [vmem:[%s2551_s2 + $0x500] sm:$0xff] }
  0x5a   :  { %v2116_v27 = vmul.f32 %v1586_v35, %v97_v3  ;;  %v103_v59 = vld [vmem:[%s2552_s0 + $0x2c8] sm:$0xff]  ;;  %707 = vmatprep.mubr.f32.mxu0 %v1908_v61  ;;  %1118 = vmatpush1.bf16.msra.mxu0 %v1939_v8  ;;  %v2136_v47 = vmul.f32 %v1586_v35, %v55_v49  ;;  %v61_v61 = vld [vmem:[%s2552_s0 + $0x178] sm:$0xff] }
  0x5b   :  { %v2139_v50 = vmul.f32 %v1586_v35, %v103_v59  ;;  %1120 = vmatprep.subr.bf16.mxu0 %v1951_v12  ;;  %1165 = vmatpush1.bf16.msra.mxu1 %v1939_v8  ;;  %v2165_v5 = vmul.f32 %v1586_v35, %v61_v61  ;;  %v60_v8 = vld [vmem:[%s2552_s0 + $0x170] sm:$0xff]  ;;  %v387_v3 = vld [vmem:[%s2551_s2 + $0x508] sm:$0xff]  ;;  %v393_v59 = vld [vmem:[%s2551_s2 + $0x538] sm:$0xff] }
  0x5c   :  { %553 = vmatmul.mubr.f32.gmra.mrb[12].mxu1 %v1911_v62  ;;  %1153 = vmatprep.subr.bf16.mxu1 %v1951_v12  ;;  %v2180_v35 = vmul.f32 %v1589_v36, %v60_v8  ;;  %v180_v62 = vmul.f32 %v1686_v21, %v58_v7  ;;  %v62_v12 = vld [vmem:[%s2552_s0 + $0x180] sm:$0xff]  ;;  %v64_v36 = vld [vmem:[%s2552_s0 + $0x190] sm:$0xff]  ;;  %v1127_v7 = vpack.c.bf16 %v389_v22, %v387_v3  ;;  %v75_v8 = vld [vmem:[%s2552_s0 + $0x1e8] sm:$0xff] }
  0x5d   :  { %708 = vmatmul.mubr.f32.gmra.mrb[12].mxu0 %v1923_v2  ;;  %558 = vmatprep.mubr.f32.mxu1 %v1942_v9  ;;  %v1125_v2 = vpack.c.bf16 %v384_v43, %v382_v55  ;;  %v69_v9 = vld [vmem:[%s2552_s0 + $0x1b8] sm:$0xff]  ;;  %v184_v49 = vmul.f32 %v1677_v17, %v62_v12  ;;  %v186_v41 = vmul.f32 %v1686_v21, %v64_v36  ;;  %v68_v61 = vld [vmem:[%s2552_s0 + $0x1b0] sm:$0xff]  ;;  %v70_v55 = vld [vmem:[%s2552_s0 + $0x1c0] sm:$0xff] }
  0x5e   :  { %713 = vmatprep.mubr.f32.mxu0 %v1949_v11  ;;  %1122 = vmatpush1.bf16.msra.mxu0 %v1953_v13  ;;  %v71_v11 = vld [vmem:[%s2552_s0 + $0x1c8] sm:$0xff]  ;;  %v191_v54 = vmul.f32 %v1571_v29, %v69_v9  ;;  %v1129_v43 = vpack.c.bf16 %v388_v25, %v386_v14  ;;  %v390_v22 = vld [vmem:[%s2551_s2 + $0x520] sm:$0xff]  ;;  %v192_v36 = vmul.f32 %v1686_v21, %v70_v55  ;;  %v81_v14 = vld [vmem:[%s2552_s0 + $0x218] sm:$0xff] }
  0x5f   :  { %1166 = vmatpush1.bf16.msra.mxu1 %v1953_v13  ;;  %1124 = vmatprep.subr.bf16.mxu0 %v1963_v15  ;;  %v391_v13 = vld [vmem:[%s2551_s2 + $0x528] sm:$0xff]  ;;  %v74_v9 = vld [vmem:[%s2552_s0 + $0x1e0] sm:$0xff] }
  0x60   :  { %559 = vmatmul.mubr.f32.gmra.mrb[14].mxu1 %v178_v48  ;;  %1154 = vmatprep.subr.bf16.mxu1 %v1963_v15  ;;  %v193_v15 = vmul.f32 %v1574_v30, %v71_v11  ;;  %v77_v48 = vld [vmem:[%s2552_s0 + $0x1f8] sm:$0xff]  ;;  %v1131_v3 = vpack.c.bf16 %v393_v59, %v391_v13  ;;  %v395_v12 = vld [vmem:[%s2551_s2 + $0x548] sm:$0xff]  ;;  %v394_v59 = vld [vmem:[%s2551_s2 + $0x540] sm:$0xff] }
  0x61   :  { %714 = vmatmul.mubr.f32.gmra.mrb[14].mxu0 %v180_v62  ;;  %564 = vmatprep.mubr.f32.mxu1 %v185_v56  ;;  %v392_v62 = vld [vmem:[%s2551_s2 + $0x530] sm:$0xff]  ;;  %v190_v56 = vmul.f32 %v1677_v17, %v68_v61  ;;  %v199_v11 = vmul.f32 %v1574_v30, %v77_v48  ;;  %v399_v61 = vld [vmem:[%s2551_s2 + $0x568] sm:$0xff] }
  0x62   :  { %719 = vmatprep.mubr.f32.mxu0 %v187_v38  ;;  %1126 = vmatpush1.bf16.msra.mxu0 %v1125_v2  ;;  %v397_v38 = vld [vmem:[%s2551_s2 + $0x558] sm:$0xff]  ;;  %v1133_v25 = vpack.c.bf16 %v392_v62, %v390_v22 }
  0x63   :  { %1167 = vmatpush1.bf16.msra.mxu1 %v1125_v2  ;;  %1128 = vmatprep.subr.bf16.mxu0 %v1127_v7  ;;  %v197_v2 = vmul.f32 %v1571_v29, %v75_v8  ;;  %v1135_v13 = vpack.c.bf16 %v397_v38, %v395_v12  ;;  %v80_v8 = vld [vmem:[%s2552_s0 + $0x210] sm:$0xff]  ;;  %v403_v12 = vld [vmem:[%s2551_s2 + $0x588] sm:$0xff]  ;;  %v405_v38 = vld [vmem:[%s2551_s2 + $0x598] sm:$0xff] }
  0x64   :  { %565 = vmatmul.mubr.f32.gmra.mrb[16].mxu1 %v184_v49  ;;  %1155 = vmatprep.subr.bf16.mxu1 %v1127_v7  ;;  %v76_v7 = vld [vmem:[%s2552_s0 + $0x1f0] sm:$0xff]  ;;  %v83_v49 = vld [vmem:[%s2552_s0 + $0x228] sm:$0xff] }
  0x65   :  { %720 = vmatmul.mubr.f32.gmra.mrb[16].mxu0 %v186_v41  ;;  %570 = vmatprep.mubr.f32.mxu1 %v191_v54  ;;  %v396_v41 = vld [vmem:[%s2551_s2 + $0x550] sm:$0xff]  ;;  %v196_v54 = vmul.f32 %v1677_v17, %v74_v9  ;;  %v198_v55 = vmul.f32 %v1686_v21, %v76_v7  ;;  %v205_v48 = vmul.f32 %v1574_v30, %v83_v49 }
  0x66   :  { %725 = vmatprep.mubr.f32.mxu0 %v193_v15  ;;  %1130 = vmatpush1.bf16.msra.mxu0 %v1129_v43  ;;  %v401_v15 = vld [vmem:[%s2551_s2 + $0x578] sm:$0xff]  ;;  %v1137_v22 = vpack.c.bf16 %v396_v41, %v394_v59  ;;  %v202_v30 = vmul.f32 %v1677_v17, %v80_v8  ;;  %v88_v9 = vld [vmem:[%s2552_s0 + $0x250] sm:$0xff]  ;;  %v1143_v7 = vpack.c.bf16 %v405_v38, %v403_v12  ;;  %v94_v41 = vld [vmem:[%s2552_s0 + $0x280] sm:$0xff] }
  0x67   :  { %1168 = vmatpush1.bf16.msra.mxu1 %v1129_v43  ;;  %1132 = vmatprep.subr.bf16.mxu0 %v1131_v3  ;;  %v203_v43 = vmul.f32 %v1571_v29, %v81_v14  ;;  %v1139_v62 = vpack.c.bf16 %v401_v15, %v399_v61  ;;  %v398_v29 = vld [vmem:[%s2551_s2 + $0x560] sm:$0xff]  ;;  %v92_v59 = vld [vmem:[%s2552_s0 + $0x270] sm:$0xff] }
  0x68   :  { %571 = vmatmul.mubr.f32.gmra.mrb[18].mxu1 %v190_v56  ;;  %1156 = vmatprep.subr.bf16.mxu1 %v1131_v3  ;;  %v82_v3 = vld [vmem:[%s2552_s0 + $0x220] sm:$0xff]  ;;  %v400_v56 = vld [vmem:[%s2551_s2 + $0x570] sm:$0xff]  ;;  %v214_v61 = vmul.f32 %v1677_v17, %v92_v59 }
  0x69   :  { %726 = vmatmul.mubr.f32.gmra.mrb[18].mxu0 %v192_v36  ;;  %576 = vmatprep.mubr.f32.mxu1 %v197_v2  ;;  %v204_v36 = vmul.f32 %v1686_v21, %v82_v3  ;;  %v86_v2 = vld [vmem:[%s2552_s0 + $0x240] sm:$0xff]  ;;  %v100_v15 = vld [vmem:[%s2552_s0 + $0x2b0] sm:$0xff] }
  0x6a   :  { %731 = vmatprep.mubr.f32.mxu0 %v199_v11  ;;  %1134 = vmatpush1.bf16.msra.mxu0 %v1133_v25  ;;  %v1141_v11 = vpack.c.bf16 %v400_v56, %v398_v29  ;;  %v402_v14 = vld [vmem:[%s2551_s2 + $0x580] sm:$0xff]  ;;  %v208_v49 = vmul.f32 %v1677_v17, %v86_v2 }
  0x6b   :  { %1169 = vmatpush1.bf16.msra.mxu1 %v1133_v25  ;;  %1136 = vmatprep.subr.bf16.mxu0 %v1135_v13  ;;  %v404_v25 = vld [vmem:[%s2551_s2 + $0x590] sm:$0xff] }
  0x6c   :  { %577 = vmatmul.mubr.f32.gmra.mrb[20].mxu1 %v196_v54  ;;  %1157 = vmatprep.subr.bf16.mxu1 %v1135_v13  ;;  %v210_v13 = vmul.f32 %v1686_v21, %v88_v9  ;;  %v1145_v54 = vpack.c.bf16 %v404_v25, %v402_v14 }
  0x6d   :  { %732 = vmatmul.mubr.f32.gmra.mrb[20].mxu0 %v198_v55  ;;  %582 = vmatprep.mubr.f32.mxu1 %v203_v43 }
  0x6e   :  { %737 = vmatprep.mubr.f32.mxu0 %v205_v48  ;;  %1138 = vmatpush1.bf16.msra.mxu0 %v1137_v22 }
  0x6f   :  { %1170 = vmatpush1.bf16.msra.mxu1 %v1137_v22  ;;  %1140 = vmatprep.subr.bf16.mxu0 %v1139_v62 }
  0x70   :  { %583 = vmatmul.mubr.f32.gmra.mrb[22].mxu1 %v202_v30  ;;  %1158 = vmatprep.subr.bf16.mxu1 %v1139_v62 }
  0x71   :  { %738 = vmatmul.mubr.f32.gmra.mrb[22].mxu0 %v204_v36  ;;  %588 = vmatprep.mubr.f32.mxu1 %v1849_v39  ;;  %v216_v39 = vmul.f32 %v1686_v21, %v94_v41 }
  0x72   :  { %743 = vmatprep.mubr.f32.mxu0 %v1852_v40  ;;  %1142 = vmatpush1.bf16.msra.mxu0 %v1141_v11  ;;  %v98_v40 = vld [vmem:[%s2552_s0 + $0x2a0] sm:$0xff] }
  0x73   :  { %1171 = vmatpush1.bf16.msra.mxu1 %v1141_v11  ;;  %1144 = vmatprep.subr.bf16.mxu0 %v1143_v7  ;;  %v220_v55 = vmul.f32 %v1677_v17, %v98_v40 }
  0x74   :  { %589 = vmatmul.mubr.f32.gmra.mrb[24].mxu1 %v208_v49  ;;  %1159 = vmatprep.subr.bf16.mxu1 %v1143_v7 }
  0x75   :  { %744 = vmatmul.mubr.f32.gmra.mrb[24].mxu0 %v210_v13  ;;  %594 = vmatprep.mubr.f32.mxu1 %v1899_v57  ;;  %v222_v57 = vmul.f32 %v1686_v21, %v100_v15 }
  0x76   :  { %749 = vmatprep.mubr.f32.mxu0 %v1902_v58  ;;  %1146 = vmatpush1.bf16.msra.mxu0 %v1145_v54 }
  0x77   :  { %1172 = vmatpush1.bf16.msra.mxu1 %v1145_v54 }
  0x78   :  { %595 = vmatmul.mubr.f32.gmra.mrb[26].mxu1 %v214_v61 }
  0x79   :  { %750 = vmatmul.mubr.f32.gmra.mrb[26].mxu0 %v216_v39  ;;  %600 = vmatprep.mubr.f32.mxu1 %v1934_v6 }
  0x7a   :  { %755 = vmatprep.mubr.f32.mxu0 %v1945_v10 }
  0x7c   :  { %601 = vmatmul.mubr.f32.gmra.mrb[28].mxu1 %v220_v55 }
  0x7d   :  { %756 = vmatmul.mubr.f32.gmra.mrb[28].mxu0 %v222_v57  ;;  %960 = vmatprep.mubr.msk.f32.mxu1 %vm406_vm0, %v1969_v18 }
  0x7e   :  { %952 = vmatprep.mubr.msk.f32.mxu0 %vm406_vm0, %v1966_v16 }
  0x80   :  { %875 = vmatmul.mubr.f32.vlgmr.msra.gmra.mrb[30].mxu1 %v1985_v24 }
  0x81   :  { %827 = vmatmul.mubr.f32.vlgmr.msra.gmra.mrb[0].mxu0 %v1982_v23  ;;  %961 = vmatprep.mubr.msk.f32.mxu1 %vm406_vm0, %v2001_v31 }
  0x82   :  { %953 = vmatprep.mubr.msk.f32.mxu0 %vm406_vm0, %v1988_v26 }
  0x84   :  { %881 = vmatmul.mubr.f32.gmra.mrb[32].mxu1 %v2007_v34 }
  0x85   :  { %833 = vmatmul.mubr.f32.gmra.mrb[2].mxu0 %v2004_v32  ;;  %962 = vmatprep.mubr.msk.f32.mxu1 %vm406_vm0, %v2024_v45 }
  0x86   :  { %954 = vmatprep.mubr.msk.f32.mxu0 %vm406_vm0, %v2021_v44 }
  0x88   :  { %887 = vmatmul.mubr.f32.gmra.mrb[34].mxu1 %v2041_v42 }
  0x89   :  { %839 = vmatmul.mubr.f32.gmra.mrb[4].mxu0 %v2027_v46  ;;  %963 = vmatprep.mubr.msk.f32.mxu1 %vm406_vm0, %v2047_v52 }
  0x8a   :  { %955 = vmatprep.mubr.msk.f32.mxu0 %vm406_vm0, %v2044_v51 }
  0x8c   :  { %893 = vmatmul.mubr.f32.gmra.mrb[36].mxu1 %v2067_v0 }
  0x8d   :  { %845 = vmatmul.mubr.f32.gmra.mrb[6].mxu0 %v2064_v63  ;;  %964 = vmatprep.mubr.msk.f32.mxu1 %vm406_vm0, %v2090_v60 }
  0x8e   :  { %956 = vmatprep.mubr.msk.f32.mxu0 %vm406_vm0, %v2070_v1 }
  0x90   :  { %899 = vmatmul.mubr.f32.gmra.mrb[38].mxu1 %v2096_v20 }
  0x91   :  { %851 = vmatmul.mubr.f32.gmra.mrb[8].mxu0 %v2093_v19  ;;  %965 = vmatprep.mubr.msk.f32.mxu1 %vm406_vm0, %v2116_v27 }
  0x92   :  { %957 = vmatprep.mubr.msk.f32.mxu0 %vm406_vm0, %v2113_v28 }
  0x94   :  { %905 = vmatmul.mubr.f32.gmra.mrb[40].mxu1 %v2133_v33 }
  0x95   :  { %857 = vmatmul.mubr.f32.gmra.mrb[10].mxu0 %v2119_v37  ;;  %966 = vmatprep.mubr.msk.f32.mxu1 %vm406_vm0, %v2139_v50 }
  0x96   :  { %958 = vmatprep.mubr.msk.f32.mxu0 %vm406_vm0, %v2136_v47 }
  0x98   :  { %911 = vmatmul.mubr.f32.gmra.mrb[42].mxu1 %v2162_v53 }
  0x99   :  { %863 = vmatmul.mubr.f32.gmra.mrb[12].mxu0 %v2159_v4 }
  0x9a   :  { %959 = vmatprep.mubr.msk.f32.mxu0 %vm406_vm0, %v2165_v5 }
  0x9d   :  { %869 = vmatmul.mubr.f32.gmra.mrb[14].mxu0 %v2180_v35 }
 0x117   :  { %v2377_v17 = vpop.f32.mrb[0].mxu1 }
 0x118   :  { %v2379_v21 = vpop.f32.mrb[1].mxu1 }
 0x11b   :  { %v2381_v58 = vpop.f32.mrb[2].mxu1 }
 0x11c   :  { %v2383_v6 = vpop.f32.mrb[3].mxu1 }
 0x11f   :  { %v2385_v10 = vpop.f32.mrb[4].mxu1 }
 0x120   :  { %v2387_v16 = vpop.f32.mrb[5].mxu1 }
 0x123   :  { %v2389_v18 = vpop.f32.mrb[6].mxu1 }
 0x124   :  { %v2391_v23 = vpop.f32.mrb[7].mxu1 }
 0x127   :  { %v2393_v24 = vpop.f32.mrb[8].mxu1 }
 0x128   :  { %v2395_v26 = vpop.f32.mrb[9].mxu1 }
 0x12b   :  { %v2397_v31 = vpop.f32.mrb[10].mxu1 }
 0x12c   :  { %v2399_v32 = vpop.f32.mrb[11].mxu1 }
 0x12f   :  { %v2401_v34 = vpop.f32.mrb[12].mxu1 }
 0x130   :  { %v2403_v44 = vpop.f32.mrb[13].mxu1 }
 0x133   :  { %v2405_v45 = vpop.f32.mrb[14].mxu1 }
 0x134   :  { %v2407_v46 = vpop.f32.mrb[15].mxu1 }
 0x137   :  { %v566_v42 = vpop.f32.mrb[16].mxu1 }
 0x138   :  { %v721_v51 = vpop.f32.mrb[16].mxu0  ;;  %v568_v52 = vpop.f32.mrb[17].mxu1 }
 0x139   :  { %v722_v63 = vadd.f32 %v721_v51, %v566_v42  ;;  %v723_v0 = vpop.f32.mrb[17].mxu0 }
 0x13a   :  { %v724_v1 = vadd.f32 %v723_v0, %v568_v52 }
 0x13b   :  { %v572_v60 = vpop.f32.mrb[18].mxu1 }
 0x13c   :  { %v727_v19 = vpop.f32.mrb[18].mxu0  ;;  %v574_v20 = vpop.f32.mrb[19].mxu1 }
 0x13d   :  { %v728_v28 = vadd.f32 %v727_v19, %v572_v60  ;;  %v729_v27 = vpop.f32.mrb[19].mxu0 }
 0x13e   :  { %v730_v37 = vadd.f32 %v729_v27, %v574_v20 }
 0x13f   :  { %v578_v33 = vpop.f32.mrb[20].mxu1 }
 0x140   :  { %v733_v47 = vpop.f32.mrb[20].mxu0  ;;  %v580_v50 = vpop.f32.mrb[21].mxu1 }
 0x141   :  { %v734_v4 = vadd.f32 %v733_v47, %v578_v33  ;;  %v735_v53 = vpop.f32.mrb[21].mxu0 }
 0x142   :  { %v736_v5 = vadd.f32 %v735_v53, %v580_v50 }
 0x143   :  { %v584_v35 = vpop.f32.mrb[22].mxu1 }
 0x144   :  { %v739_v43 = vpop.f32.mrb[22].mxu0  ;;  %v586_v8 = vpop.f32.mrb[23].mxu1 }
 0x145   :  { %v740_v48 = vadd.f32 %v739_v43, %v584_v35  ;;  %v741_v3 = vpop.f32.mrb[23].mxu0 }
 0x146   :  { %v2409_v22 = vadd.f32 %v741_v3, %v586_v8 }
 0x147   :  { %v590_v62 = vpop.f32.mrb[24].mxu1 }
 0x148   :  { %v745_v29 = vpop.f32.mrb[24].mxu0  ;;  %v592_v56 = vpop.f32.mrb[25].mxu1 }
 0x149   :  { %v2411_v30 = vadd.f32 %v745_v29, %v590_v62  ;;  %v747_v12 = vpop.f32.mrb[25].mxu0 }
 0x14a   :  { %v2413_v38 = vadd.f32 %v747_v12, %v592_v56 }
 0x14b   :  { %v596_v36 = vpop.f32.mrb[26].mxu1 }
 0x14c   :  { %v751_v2 = vpop.f32.mrb[26].mxu0  ;;  %v598_v9 = vpop.f32.mrb[27].mxu1 }
 0x14d   :  { %v2415_v11 = vadd.f32 %v751_v2, %v596_v36  ;;  %v753_v7 = vpop.f32.mrb[27].mxu0 }
 0x14e   :  { %v2417_v14 = vadd.f32 %v753_v7, %v598_v9 }
 0x14f   :  { %v602_v25 = vpop.f32.mrb[28].mxu1 }
 0x150   :  { %v757_v49 = vpop.f32.mrb[28].mxu0  ;;  %v604_v13 = vpop.f32.mrb[29].mxu1 }
 0x151   :  { %v2419_v59 = vadd.f32 %v757_v49, %v602_v25  ;;  %v759_v41 = vpop.f32.mrb[29].mxu0 }
 0x152   :  { %v2421_v54 = vadd.f32 %v759_v41, %v604_v13 }
 0x153   :  { %v876_v61 = vpop.f32.mrb[30].mxu1 }
 0x154   :  { %v828_v39 = vpop.f32.mrb[0].mxu0  ;;  %v877_v40 = vadd.f32 %v876_v61, %v722_v63  ;;  %v878_v15 = vpop.f32.mrb[31].mxu1 }
 0x155   :  { %v1173_v55 = vadd.f32 %v828_v39, %v2377_v17  ;;  %v830_v57 = vpop.f32.mrb[1].mxu0  ;;  %v879_v42 = vadd.f32 %v878_v15, %v724_v1 }
 0x156   :  { %934 = vst [vmem:[%s2554_s3 + $0x80] sm:$0xff] %v877_v40  ;;  %v1174_v51 = vadd.f32 %v830_v57, %v2379_v21 }
 0x157   :  { %917 = vst [vmem:[%s2554_s3] sm:$0xff] %v1173_v55  ;;  %935 = vst.msk [vmem:[%s2554_s3 + $0x88] sm:$0xff] %vm918_vm1, %v879_v42  ;;  %v882_v52 = vpop.f32.mrb[32].mxu1 }
 0x158   :  { %919 = vst.msk [vmem:[%s2554_s3 + $0x8] sm:$0xff] %vm918_vm1, %v1174_v51  ;;  %v834_v17 = vpop.f32.mrb[2].mxu0  ;;  %v883_v63 = vadd.f32 %v882_v52, %v728_v28  ;;  %v884_v0 = vpop.f32.mrb[33].mxu1 }
 0x159   :  { %v1175_v21 = vadd.f32 %v834_v17, %v2381_v58  ;;  %v836_v1 = vpop.f32.mrb[3].mxu0  ;;  %v885_v60 = vadd.f32 %v884_v0, %v730_v37 }
 0x15a   :  { %936 = vst [vmem:[%s2554_s3 + $0x90] sm:$0xff] %v883_v63  ;;  %v1176_v19 = vadd.f32 %v836_v1, %v2383_v6 }
 0x15b   :  { %920 = vst [vmem:[%s2554_s3 + $0x10] sm:$0xff] %v1175_v21  ;;  %937 = vst.msk [vmem:[%s2554_s3 + $0x98] sm:$0xff] %vm918_vm1, %v885_v60  ;;  %v888_v20 = vpop.f32.mrb[34].mxu1 }
 0x15c   :  { %921 = vst.msk [vmem:[%s2554_s3 + $0x18] sm:$0xff] %vm918_vm1, %v1176_v19  ;;  %v840_v58 = vpop.f32.mrb[4].mxu0  ;;  %v889_v28 = vadd.f32 %v888_v20, %v734_v4  ;;  %v890_v27 = vpop.f32.mrb[35].mxu1 }
 0x15d   :  { %v1177_v6 = vadd.f32 %v840_v58, %v2385_v10  ;;  %v842_v37 = vpop.f32.mrb[5].mxu0  ;;  %v891_v33 = vadd.f32 %v890_v27, %v736_v5 }
 0x15e   :  { %938 = vst [vmem:[%s2554_s3 + $0xa0] sm:$0xff] %v889_v28  ;;  %v1178_v47 = vadd.f32 %v842_v37, %v2387_v16 }
 0x15f   :  { %922 = vst [vmem:[%s2554_s3 + $0x20] sm:$0xff] %v1177_v6  ;;  %939 = vst.msk [vmem:[%s2554_s3 + $0xa8] sm:$0xff] %vm918_vm1, %v891_v33  ;;  %v894_v50 = vpop.f32.mrb[36].mxu1 }
 0x160   :  { %923 = vst.msk [vmem:[%s2554_s3 + $0x28] sm:$0xff] %vm918_vm1, %v1178_v47  ;;  %v846_v10 = vpop.f32.mrb[6].mxu0  ;;  %v895_v4 = vadd.f32 %v894_v50, %v740_v48  ;;  %v896_v53 = vpop.f32.mrb[37].mxu1 }
 0x161   :  { %v1179_v16 = vadd.f32 %v846_v10, %v2389_v18  ;;  %v848_v5 = vpop.f32.mrb[7].mxu0  ;;  %v897_v35 = vadd.f32 %v896_v53, %v2409_v22 }
 0x162   :  { %940 = vst [vmem:[%s2554_s3 + $0xb0] sm:$0xff] %v895_v4  ;;  %v1180_v43 = vadd.f32 %v848_v5, %v2391_v23 }
 0x163   :  { %924 = vst [vmem:[%s2554_s3 + $0x30] sm:$0xff] %v1179_v16  ;;  %941 = vst.msk [vmem:[%s2554_s3 + $0xb8] sm:$0xff] %vm918_vm1, %v897_v35  ;;  %v900_v8 = vpop.f32.mrb[38].mxu1 }
 0x164   :  { %925 = vst.msk [vmem:[%s2554_s3 + $0x38] sm:$0xff] %vm918_vm1, %v1180_v43  ;;  %v852_v18 = vpop.f32.mrb[8].mxu0  ;;  %v901_v48 = vadd.f32 %v900_v8, %v2411_v30  ;;  %v902_v3 = vpop.f32.mrb[39].mxu1 }
 0x165   :  { %v1181_v23 = vadd.f32 %v852_v18, %v2393_v24  ;;  %v854_v22 = vpop.f32.mrb[9].mxu0  ;;  %v903_v62 = vadd.f32 %v902_v3, %v2413_v38 }
 0x166   :  { %942 = vst [vmem:[%s2554_s3 + $0xc0] sm:$0xff] %v901_v48  ;;  %v1182_v29 = vadd.f32 %v854_v22, %v2395_v26 }
 0x167   :  { %926 = vst [vmem:[%s2554_s3 + $0x40] sm:$0xff] %v1181_v23  ;;  %943 = vst.msk [vmem:[%s2554_s3 + $0xc8] sm:$0xff] %vm918_vm1, %v903_v62  ;;  %v906_v56 = vpop.f32.mrb[40].mxu1 }
 0x168   :  { %927 = vst.msk [vmem:[%s2554_s3 + $0x48] sm:$0xff] %vm918_vm1, %v1182_v29  ;;  %v858_v24 = vpop.f32.mrb[10].mxu0  ;;  %v907_v30 = vadd.f32 %v906_v56, %v2415_v11  ;;  %v908_v12 = vpop.f32.mrb[41].mxu1 }
 0x169   :  { %v1183_v26 = vadd.f32 %v858_v24, %v2397_v31  ;;  %v860_v38 = vpop.f32.mrb[11].mxu0  ;;  %v909_v36 = vadd.f32 %v908_v12, %v2417_v14 }
 0x16a   :  { %944 = vst [vmem:[%s2554_s3 + $0xd0] sm:$0xff] %v907_v30  ;;  %v1184_v2 = vadd.f32 %v860_v38, %v2399_v32 }
 0x16b   :  { %928 = vst [vmem:[%s2554_s3 + $0x50] sm:$0xff] %v1183_v26  ;;  %945 = vst.msk [vmem:[%s2554_s3 + $0xd8] sm:$0xff] %vm918_vm1, %v909_v36  ;;  %v912_v9 = vpop.f32.mrb[42].mxu1 }
 0x16c   :  { %929 = vst.msk [vmem:[%s2554_s3 + $0x58] sm:$0xff] %vm918_vm1, %v1184_v2  ;;  %v864_v31 = vpop.f32.mrb[12].mxu0  ;;  %v913_v11 = vadd.f32 %v912_v9, %v2419_v59  ;;  %v914_v7 = vpop.f32.mrb[43].mxu1 }
 0x16d   :  { %v1185_v32 = vadd.f32 %v864_v31, %v2401_v34  ;;  %v866_v14 = vpop.f32.mrb[13].mxu0  ;;  %v915_v25 = vadd.f32 %v914_v7, %v2421_v54 }
 0x16e   :  { %946 = vst [vmem:[%s2554_s3 + $0xe0] sm:$0xff] %v913_v11  ;;  %v1186_v49 = vadd.f32 %v866_v14, %v2403_v44 }
 0x16f   :  { %930 = vst [vmem:[%s2554_s3 + $0x60] sm:$0xff] %v1185_v32  ;;  %947 = vst.msk [vmem:[%s2554_s3 + $0xe8] sm:$0xff] %vm918_vm1, %v915_v25 }
 0x170   :  { %931 = vst.msk [vmem:[%s2554_s3 + $0x68] sm:$0xff] %vm918_vm1, %v1186_v49  ;;  %v870_v34 = vpop.f32.mrb[14].mxu0 }
 0x171   :  { %v1187_v13 = vadd.f32 %v870_v34, %v2405_v45  ;;  %v872_v59 = vpop.f32.mrb[15].mxu0 }
 0x172   :  { %v1188_v44 = vadd.f32 %v872_v59, %v2407_v46 }
 0x173   :  { %932 = vst [vmem:[%s2554_s3 + $0x70] sm:$0xff] %v1187_v13 }
 0x174   :  { %933 = vst.msk [vmem:[%s2554_s3 + $0x78] sm:$0xff] %vm918_vm1, %v1188_v44 }

</bundles_post_ra>
